<compile_context>
chip_gen: v5e
topology: v5e:2x2
jax: 0.10.0
libtpu: 0.0.40
codegen_flags: <defaults>
</compile_context>

<pallas_src>
from typing import NamedTuple

import jax
import jax.numpy as jnp
from jax import lax
from jax.experimental import pallas as pl
from jax.experimental.pallas import tpu as pltpu


# ---------------------------------------------------------------------------
# Kernel 1: fused GCN row slab (both passes at once).
#   h[m_blk, :] = relu( adj[m_blk, :] @ xw_packed + bias_packed )
# adj slab (tm, N_pad) bf16, xw_packed (N_pad, 2H) bf16 resident, f32 accumulate.
# ---------------------------------------------------------------------------
def gcn_rowslab_kernel(adj_ref, xw_ref, bias_ref, h_ref):
    acc = jnp.dot(adj_ref[...], xw_ref[...], preferred_element_type=jnp.float32)
    h_ref[...] = jnp.maximum(acc + bias_ref[...], 0.0)


# ---------------------------------------------------------------------------
# Kernel 2: AvgReadout + Sigmoid + Bilinear discriminator (single grid step).
#   c   = sigmoid( (sum over true-N rows of h1) / N )
#   v   = W_bil @ c^T
#   sc1 = h1 @ v + b_bil + samp_bias1 ; sc2 = h2 @ v + b_bil + samp_bias2
# Output is (N_pad, 2) columns [sc1 | sc2]; rows >= N are discarded by the wrapper.
# ---------------------------------------------------------------------------
def readout_disc_kernel(n_ref, invn_ref, bbil_ref, h_ref, wbil_ref,
                        sb1_ref, sb2_ref, out_ref):
    nh = wbil_ref.shape[0]
    n_pad = h_ref.shape[0]
    h1 = h_ref[:, :nh]                                                  # [N_pad, H]
    h2 = h_ref[:, nh:]                                                  # [N_pad, H]

    # masked mean with the TRUE node count (padded rows contribute relu(bias) != 0)
    row_ids = lax.broadcasted_iota(jnp.int32, (n_pad, nh), 0)
    mask = (row_ids < n_ref[0]).astype(jnp.float32)
    c = jax.nn.sigmoid(jnp.sum(h1 * mask, axis=0, keepdims=True) * invn_ref[0])  # [1, H]

    # v[i] = sum_j W_bil[i, j] * c[j]  (small; avoids relayout of the big h tensors)
    v = lax.dot_general(wbil_ref[...], c, (((1,), (1,)), ((), ())),
                        preferred_element_type=jnp.float32)             # [H, 1]

    bb = bbil_ref[0]
    sc1 = jnp.dot(h1, v, preferred_element_type=jnp.float32) + bb + sb1_ref[...]
    sc2 = jnp.dot(h2, v, preferred_element_type=jnp.float32) + bb + sb2_ref[...]
    out_ref[...] = jnp.concatenate([sc1, sc2], axis=1)                  # [N_pad, 2]


# ---------------------------------------------------------------------------
# Generation-aware sizing helpers.
# ---------------------------------------------------------------------------
def _round_up(x, m):
    return ((x + m - 1) // m) * m


def _vmem_capacity_bytes():
    try:
        info = pltpu.get_tpu_info()
        cap = getattr(info, "vmem_capacity_bytes", None)
        if cap:
            return int(cap)
    except Exception:
        pass
    return 64 * 1024 * 1024            # conservative (v7x per-core physical VMEM)


def _select_tm(n_pad, two_h, budget_bytes):
    """Largest row-slab height (divides n_pad, multiple of 8) that fits VMEM."""
    for tm in (512, 256, 128, 64, 32, 16, 8):
        if n_pad % tm:
            continue
        need = (4 * tm * n_pad          # adj slab bf16, double buffered
                + 4 * two_h * n_pad     # xw_packed bf16, (up to) 2 buffers
                + 8 * two_h * tm        # f32 output tile, double buffered
                + (2 << 20))            # margin / compiler scratch
        if need <= budget_bytes:
            return tm
    return 8


class PreparedAdj(NamedTuple):
    adj_bf16: jax.Array   # [n_pad, n_pad] bf16, zero-padded
    n: int                # true node count
    n_pad: int
    tm: int
    vmem_limit: int


def prepare_adjacency(adj, hid_units=64):
    """Pad + cast the (static) DMGI adjacency ONCE; reuse across forward calls.

    Re-casting adj to bf16 every forward costs an extra full HBM pass over the
    dominant N^2 operand, so it is hoisted here (amortized over training).
    """
    adj2d = adj[0] if adj.ndim == 3 else adj
    n = adj2d.shape[0]
    n_pad = _round_up(max(n, 256), 256)

    cap = _vmem_capacity_bytes()
    vmem_limit = int(min(cap * 3 // 4, 100 * 1024 * 1024))   # ~48 MiB v7x, ~96 MiB v5e/v6e
    tm = _select_tm(n_pad, 2 * hid_units, vmem_limit - (8 << 20))

    adj_p = jnp.pad(adj2d.astype(jnp.bfloat16),
                    ((0, n_pad - n), (0, n_pad - n)))
    return PreparedAdj(adj_p, n, n_pad, tm, vmem_limit)


# ---------------------------------------------------------------------------
# modeler.forward
# ---------------------------------------------------------------------------
def modeler_forward(params, seq1, seq2, adj, sparse=False, msk=None,
                    samp_bias1=None, samp_bias2=None):
    # TODO(synk): sparse (torch.spmm) path not implemented; adj is treated as dense.
    # TODO(synk): msk-based readout not implemented (DMGI passes msk=None).
    del sparse, msk
    w_gcn, b_gcn, w_bil, b_bil = params
    h_units = w_gcn.shape[1]
    two_h = 2 * h_units

    if not isinstance(adj, PreparedAdj):
        adj = prepare_adjacency(adj, hid_units=h_units)     # amortize outside training loop
    prep = adj
    n, n_pad, tm = prep.n, prep.n_pad, prep.tm

    seq1_2d = seq1[0] if seq1.ndim == 3 else seq1
    seq2_2d = seq2[0] if seq2.ndim == 3 else seq2

    # Feature projection hoisted out of the kernel (tiny fraction of FLOPs / bytes).
    xw1 = jnp.dot(seq1_2d, w_gcn)
    xw2 = jnp.dot(seq2_2d, w_gcn)
    xw_packed = jnp.concatenate([xw1, xw2], axis=1).astype(jnp.bfloat16)   # [N, 2H]
    xw_packed = jnp.pad(xw_packed, ((0, n_pad - n), (0, 0)))               # [N_pad, 2H]

    bias_packed = jnp.concatenate(
        [b_gcn.reshape(1, -1), b_gcn.reshape(1, -1)], axis=1).astype(jnp.float32)  # [1, 2H]

    # ---- heavy kernel: both GCN aggregations over contiguous adj row slabs ----
    h_packed = pl.pallas_call(
        gcn_rowslab_kernel,
        out_shape=jax.ShapeDtypeStruct((n_pad, two_h), jnp.float32),
        grid=(n_pad // tm,),
        in_specs=[
            pl.BlockSpec((tm, n_pad), lambda i: (i, 0)),       # adj row slab (contiguous)
            pl.BlockSpec((n_pad, two_h), lambda i: (0, 0)),    # packed projections (resident)
            pl.BlockSpec((1, two_h), lambda i: (0, 0)),        # packed GCN bias
        ],
        out_specs=pl.BlockSpec((tm, two_h), lambda i: (i, 0)),
        compiler_params=pltpu.CompilerParams(
            dimension_semantics=("parallel",),                 # megacore sharding on v7x
            vmem_limit_bytes=prep.vmem_limit,
        ),
    )(prep.adj_bf16, xw_packed, bias_packed)

    # samp_bias may be None in the torch modeler -> zeros
    def _col_bias(sb):
        if sb is None:
            return jnp.zeros((n_pad, 1), jnp.float32)
        sb = jnp.asarray(sb, jnp.float32).reshape(-1)
        return jnp.pad(sb, (0, n_pad - n)).reshape(n_pad, 1)

    sb1_col = _col_bias(samp_bias1)
    sb2_col = _col_bias(samp_bias2)

    n_arr = jnp.array([n], jnp.int32)
    invn_arr = jnp.array([1.0 / n], jnp.float32)
    bbil_arr = jnp.asarray(b_bil, jnp.float32).reshape(-1)[:1]

    # ---- tiny epilogue kernel: readout + bilinear discriminator ----
    sc_cols = pl.pallas_call(
        readout_disc_kernel,
        out_shape=jax.ShapeDtypeStruct((n_pad, 2), jnp.float32),
        grid=(1,),
        in_specs=[
            pl.BlockSpec(memory_space=pltpu.MemorySpace.SMEM),     # true node count
            pl.BlockSpec(memory_space=pltpu.MemorySpace.SMEM),     # 1 / N
            pl.BlockSpec(memory_space=pltpu.MemorySpace.SMEM),     # bilinear bias
            pl.BlockSpec((n_pad, two_h), lambda i: (0, 0)),        # h packed
            pl.BlockSpec((h_units, h_units), lambda i: (0, 0)),    # bilinear weight
            pl.BlockSpec((n_pad, 1), lambda i: (0, 0)),            # samp_bias1 (col)
            pl.BlockSpec((n_pad, 1), lambda i: (0, 0)),            # samp_bias2 (col)
        ],
        out_specs=pl.BlockSpec((n_pad, 2), lambda i: (0, 0)),
        compiler_params=pltpu.CompilerParams(
            dimension_semantics=("arbitrary",),
            vmem_limit_bytes=prep.vmem_limit,
        ),
    )(n_arr, invn_arr, bbil_arr, h_packed, w_bil.astype(jnp.float32),
      sb1_col, sb2_col)

    sc1 = sc_cols[:n, 0]
    sc2 = sc_cols[:n, 1]
    return jnp.concatenate([sc1, sc2])[None, :]        # == torch.cat((sc1, sc2), dim=1)


if __name__ == "__main__":
    # small shapes consistent with the module: B=1 graph, N nodes, F features, H hidden
    N, F, H = 256, 64, 64
    key = jax.random.PRNGKey(0)
    k1, k2, k3, k4, k5, k6 = jax.random.split(key, 6)

    # deterministic parameter init (xavier-ish uniform), GCN bias zeros as in GCN.__init__
    lim_g = (6.0 / (F + H)) ** 0.5
    w_gcn = jax.random.uniform(k1, (F, H), jnp.float32, -lim_g, lim_g)
    b_gcn = jnp.zeros((1, H), jnp.float32)
    lim_b = (6.0 / (H + H)) ** 0.5
    w_bil = jax.random.uniform(k2, (H, H), jnp.float32, -lim_b, lim_b)   # nn.Bilinear weight [1,H,H] squeezed
    b_bil = jax.random.uniform(k3, (1,), jnp.float32, -0.1, 0.1)         # nn.Bilinear bias [1]
    params = (w_gcn, b_gcn, w_bil, b_bil)

    # inputs
    seq1 = jax.random.normal(k4, (1, N, F), jnp.float32)
    seq2 = jax.random.normal(k5, (1, N, F), jnp.float32)                 # "shuffled" negatives
    adj_raw = jax.random.uniform(k6, (N, N), jnp.float32)
    adj = (adj_raw / jnp.sum(adj_raw, axis=1, keepdims=True))[None]      # [1, N, N] row-normalized
    samp_bias1 = jnp.zeros((1, N), jnp.float32)
    samp_bias2 = jnp.zeros((1, N), jnp.float32)
    msk = None

    # amortize the static-adjacency preprocessing (pad + bf16 cast) once
    prep = prepare_adjacency(adj, hid_units=H)

    logits = modeler_forward(params, seq1, seq2, prep, False, msk,
                             samp_bias1, samp_bias2)
    logits = jax.block_until_ready(logits)
    assert logits.shape == (1, 2 * N), logits.shape

    # pure-JAX f32 reference (kernel uses bf16 operands for adj @ xw with f32
    # accumulation, so tolerance is loosened vs. the pure-f32 reference)
    def gcn_ref(seq):
        return jnp.maximum(adj[0] @ (seq[0] @ w_gcn) + b_gcn, 0.0)

    h1r, h2r = gcn_ref(seq1), gcn_ref(seq2)
    c = jax.nn.sigmoid(jnp.mean(h1r, axis=0))
    sc1 = h1r @ (w_bil @ c) + b_bil[0] + samp_bias1[0]
    sc2 = h2r @ (w_bil @ c) + b_bil[0] + samp_bias2[0]
    ref_logits = jnp.concatenate([sc1, sc2])[None]

    assert jnp.allclose(logits, ref_logits, atol=2e-2, rtol=2e-2), \
        float(jnp.max(jnp.abs(logits - ref_logits)))

    print("KERNEL_OK")
</pallas_src>

<mosaic_0001>
module attributes {stable_mosaic.version = 11 : i64} {
  func.func @gcn_rowslab_kernel(%arg0: i32, %arg1: memref<256x256xbf16, #tpu.memory_space<vmem>>, %arg2: memref<256x128xbf16, #tpu.memory_space<vmem>>, %arg3: memref<1x128xf32, #tpu.memory_space<vmem>>, %arg4: memref<256x128xf32, #tpu.memory_space<vmem>>) attributes {dimension_semantics = [#tpu.dimension_semantics<parallel>], iteration_bounds = array<i64: 1>, scalar_prefetch = 0 : i64, scratch_operands = 0 : i64, tpu.core_type = #tpu.core_type<tc>, window_params = [{transform_indices = @transform_0, window_bounds = array<i64: 256, 256>}, {pipeline_mode = #tpu.pipeline_mode<synchronous>, transform_indices = @transform_1, window_bounds = array<i64: 256, 128>}, {pipeline_mode = #tpu.pipeline_mode<synchronous>, transform_indices = @transform_2, window_bounds = array<i64: 1, 128>}, {transform_indices = @transform_3, window_bounds = array<i64: 256, 128>}]} {
    %c0 = arith.constant 0 : index
    %c0_0 = arith.constant 0 : index
    %0 = vector.load %arg1[%c0, %c0_0] : memref<256x256xbf16, #tpu.memory_space<vmem>>, vector<256x256xbf16>
    %c0_1 = arith.constant 0 : index
    %c0_2 = arith.constant 0 : index
    %1 = vector.load %arg2[%c0_1, %c0_2] : memref<256x128xbf16, #tpu.memory_space<vmem>>, vector<256x128xbf16>
    %cst = arith.constant dense<0.000000e+00> : vector<256x128xf32>
    %2 = tpu.matmul %0, %1, %cst {dimension_numbers = #tpu.dot_dimension_numbers<[1], [0], [0], [1], [0, 0, 1, 1], [], []>} : vector<256x256xbf16>, vector<256x128xbf16>, vector<256x128xf32> -> vector<256x128xf32>
    %c0_3 = arith.constant 0 : index
    %c0_4 = arith.constant 0 : index
    %3 = vector.load %arg3[%c0_3, %c0_4] : memref<1x128xf32, #tpu.memory_space<vmem>>, vector<1x128xf32>
    %4 = vector.broadcast %3 : vector<1x128xf32> to vector<256x128xf32>
    %5 = arith.addf %2, %4 : vector<256x128xf32>
    %cst_5 = arith.constant 0.000000e+00 : f32
    %6 = vector.broadcast %cst_5 : f32 to vector<256x128xf32>
    %7 = arith.maximumf %5, %6 : vector<256x128xf32>
    %c0_6 = arith.constant 0 : index
    %c0_7 = arith.constant 0 : index
    %8 = vector.load %arg4[%c0_6, %c0_7] : memref<256x128xf32, #tpu.memory_space<vmem>>, vector<256x128xf32>
    tpu.vector_store %arg4[%c0_6, %c0_7], %7 {strides = array<i32>} : memref<256x128xf32, #tpu.memory_space<vmem>>, vector<256x128xf32>,
    return
  }
  func.func @transform_0(%arg0: i32) -> (i32, i32) {
    %c0_i32 = arith.constant 0 : i32
    %c0_i32_0 = arith.constant 0 : i32
    return %arg0, %c0_i32 : i32, i32
  }
  func.func @transform_1(%arg0: i32) -> (i32, i32) {
    %c0_i32 = arith.constant 0 : i32
    %c0_i32_0 = arith.constant 0 : i32
    %c0_i32_1 = arith.constant 0 : i32
    return %c0_i32, %c0_i32_0 : i32, i32
  }
  func.func @transform_2(%arg0: i32) -> (i32, i32) {
    %c0_i32 = arith.constant 0 : i32
    %c0_i32_0 = arith.constant 0 : i32
    %c0_i32_1 = arith.constant 0 : i32
    return %c0_i32, %c0_i32_0 : i32, i32
  }
  func.func @transform_3(%arg0: i32) -> (i32, i32) {
    %c0_i32 = arith.constant 0 : i32
    %c0_i32_0 = arith.constant 0 : i32
    return %arg0, %c0_i32 : i32, i32
  }
}

</mosaic_0001>

<bundles_post_ra>
// kernel: tpu_custom_call.1
= control target key start
LH: loop header
LB: loop body
LE: loop exit
PB: predicated region body
PF: predicated region fallthrough
CT: control target
= control target key end

     0   :  { %8 = vsyncpa [#allocation3], 0  ;;  %s1054_s0 = inlined_call_operand.hbm [shape: bf16[256,256], index: 0, kind: input, shape index: {}]   ;;  %s1055_s1 = inlined_call_operand.hbm [shape: bf16[256,128], index: 1, kind: input, shape index: {}]   ;;  %s1056_s2 = inlined_call_operand.vmem [shape: f32[1,128], index: 2, kind: input, shape index: {}]   ;;  %s1057_s3 = inlined_call_operand.hbm [shape: f32[256,128], index: 3, kind: output, shape index: {}]  }
   0x1   :  { %9 = vsyncpa [#allocation6], 0 }
   0x2   :  { %10 = vsyncpa [#allocation4], 0  ;;  %s15_s14 = sshll.u32 %s1054_s0, 4  ;;  %s975_s15 = smov [#allocation2]   ;;  %s16_s14 = int_to_ptr.hbm [resolvable:$true] %s15_s14 }
   0x3   :  { %s17_s16 = sshll.u32 %s975_s15, 4  ;;  %s28_s19 = sshll.u32 %s1055_s1, 4  ;;  %s18_s16 = int_to_ptr.vmem [resolvable:$true] %s17_s16  ;;  %s29_s19 = int_to_ptr.hbm [resolvable:$true] %s28_s19 }
   0x4   :  { %s976_s20 = smov 128   ;;  %s977_s21 = smov 8  }
   0x5   :  { %23 = dma.hbm_to_vmem [thread:$0]  %s16_s14, 4096, %s18_s16, [#allocation3], %s976_s20, %s976_s20, %s977_s21  }
   0x6   :  { %s978_s22 = smov [#allocation5]   ;;  %s979_s24 = smov 64  }
   0x7   :  { %s30_s23 = sshll.u32 %s978_s22, 4  ;;  %s980_s0 = smov 4   ;;  %s31_s23 = int_to_ptr.vmem [resolvable:$true] %s30_s23 }
   0x8   :  { %36 = dma.hbm_to_vmem [thread:$0]  %s29_s19, 2048, %s31_s23, [#allocation6], %s979_s24, %s979_s24, %s980_s0  }
   0x9   :  { %969 = dma.done.wait [#allocation3], 4096  }
   0xa   :  { %970 = vsyncadd [#allocation3], 4294963200 }
   0xb   :  { %971 = dma.done.wait [#allocation6], 2048  }
   0xc   :  { %972 = vsyncadd [#allocation6], 4294965248  ;;  %v864_v0 = vld [vmem:[#allocation5 + $0x38] sm:$0xff]  ;;  %v863_v2 = vld [vmem:[#allocation5 + $0x30] sm:$0xff]  ;;  %s619_s29 = sshll.u32 %s1057_s3, 4  ;;  %s620_s29 = int_to_ptr.hbm [resolvable:$true] %s619_s29 }
   0xd   :  { %v872_v1 = vld [vmem:[#allocation5 + $0x78] sm:$0xff]  ;;  %371 = vmatpush.bf16.msra.mxu0 %v864_v0  ;;  %873 = vmatpush.bf16.msra.mxu2 %v864_v0  ;;  %v871_v3 = vld [vmem:[#allocation5 + $0x70] sm:$0xff]  ;;  %v862_v4 = vld [vmem:[#allocation5 + $0x28] sm:$0xff] }
   0xe   :  { %460 = vmatpush.bf16.msra.mxu1 %v872_v1  ;;  %881 = vmatpush.bf16.msra.mxu3 %v872_v1  ;;  %v870_v5 = vld [vmem:[#allocation5 + $0x68] sm:$0xff]  ;;  %v861_v6 = vld [vmem:[#allocation5 + $0x20] sm:$0xff]  ;;  %v860_v8 = vld [vmem:[#allocation5 + $0x18] sm:$0xff] }
   0xf   :  { %v869_v7 = vld [vmem:[#allocation5 + $0x60] sm:$0xff]  ;;  %v868_v9 = vld [vmem:[#allocation5 + $0x58] sm:$0xff]  ;;  %v859_v10 = vld [vmem:[#allocation5 + $0x10] sm:$0xff] }
  0x10   :  { %v867_v11 = vld [vmem:[#allocation5 + $0x50] sm:$0xff]  ;;  %v858_v12 = vld [vmem:[#allocation5 + $0x8] sm:$0xff]  ;;  %v857_v14 = vld [vmem:[#allocation5] sm:$0xff] }
  0x11   :  { %372 = vmatpush.bf16.msra.mxu0 %v863_v2  ;;  %874 = vmatpush.bf16.msra.mxu2 %v863_v2  ;;  %v866_v13 = vld [vmem:[#allocation5 + $0x48] sm:$0xff]  ;;  %v865_v15 = vld [vmem:[#allocation5 + $0x40] sm:$0xff]  ;;  %v643_v28 = vld [vmem:[#allocation2 + $0x10] sm:$0xf] }
  0x12   :  { %461 = vmatpush.bf16.msra.mxu1 %v871_v3  ;;  %882 = vmatpush.bf16.msra.mxu3 %v871_v3  ;;  %v635_v16 = vld [vmem:[#allocation2] sm:$0xf]  ;;  %v826_v17 = vld [vmem:[#allocation2 + $0x4] sm:$0xf0]  ;;  %v825_v20 = vld [vmem:[#allocation2 + $0x4] sm:$0xf] }
  0x13   :  { %v699_v18 = vld [vmem:[#allocation2 + $0x80] sm:$0xf]  ;;  %v842_v19 = vld [vmem:[#allocation2 + $0x84] sm:$0xf0]  ;;  %v637_v21 = vld [vmem:[#allocation2 + $0x8] sm:$0xf0]  ;;  %v636_v24 = vor.u32 %v826_v17, %v635_v16 }
  0x14   :  { %v841_v22 = vld [vmem:[#allocation2 + $0x84] sm:$0xf]  ;;  %v701_v23 = vld [vmem:[#allocation2 + $0x88] sm:$0xf0]  ;;  %v700_v25 = vor.u32 %v842_v19, %v699_v18  ;;  %v640_v26 = vor.u32 %v825_v20, %v637_v21  ;;  %v828_v29 = vld [vmem:[#allocation2 + $0x14] sm:$0xf0] }
  0x15   :  { %373 = vmatpush.bf16.msra.mxu0 %v862_v4  ;;  %875 = vmatpush.bf16.msra.mxu2 %v862_v4  ;;  %v704_v27 = vor.u32 %v841_v22, %v701_v23  ;;  %v707_v30 = vld [vmem:[#allocation2 + $0x90] sm:$0xf]  ;;  %v844_v31 = vld [vmem:[#allocation2 + $0x94] sm:$0xf0]  ;;  %v827_v32 = vld [vmem:[#allocation2 + $0x14] sm:$0xf]  ;;  %v644_v36 = vor.u32 %v828_v29, %v643_v28 }
  0x16   :  { %462 = vmatpush.bf16.msra.mxu1 %v870_v5  ;;  %883 = vmatpush.bf16.msra.mxu3 %v870_v5  ;;  %v645_v33 = vld [vmem:[#allocation2 + $0x18] sm:$0xf0]  ;;  %v843_v34 = vld [vmem:[#allocation2 + $0x94] sm:$0xf]  ;;  %v708_v37 = vor.u32 %v844_v31, %v707_v30  ;;  %v651_v40 = vld [vmem:[#allocation2 + $0x20] sm:$0xf] }
  0x17   :  { %v709_v35 = vld [vmem:[#allocation2 + $0x98] sm:$0xf0]  ;;  %v648_v38 = vor.u32 %v827_v32, %v645_v33  ;;  %v830_v41 = vld [vmem:[#allocation2 + $0x24] sm:$0xf0]  ;;  %v715_v42 = vld [vmem:[#allocation2 + $0xa0] sm:$0xf] }
  0x18   :  { %v712_v39 = vor.u32 %v843_v34, %v709_v35  ;;  %v846_v43 = vld [vmem:[#allocation2 + $0xa4] sm:$0xf0]  ;;  %v829_v44 = vld [vmem:[#allocation2 + $0x24] sm:$0xf]  ;;  %v653_v45 = vld [vmem:[#allocation2 + $0x28] sm:$0xf0]  ;;  %v652_v48 = vor.u32 %v830_v41, %v651_v40 }
  0x19   :  { %374 = vmatpush.bf16.msra.mxu0 %v861_v6  ;;  %876 = vmatpush.bf16.msra.mxu2 %v861_v6  ;;  %v845_v46 = vld [vmem:[#allocation2 + $0xa4] sm:$0xf]  ;;  %v717_v47 = vld [vmem:[#allocation2 + $0xa8] sm:$0xf0]  ;;  %v716_v49 = vor.u32 %v846_v43, %v715_v42  ;;  %v656_v50 = vor.u32 %v829_v44, %v653_v45  ;;  %v659_v52 = vld [vmem:[#allocation2 + $0x30] sm:$0xf] }
  0x1a   :  { %463 = vmatpush.bf16.msra.mxu1 %v869_v7  ;;  %884 = vmatpush.bf16.msra.mxu3 %v869_v7  ;;  %v720_v51 = vor.u32 %v845_v46, %v717_v47  ;;  %v832_v53 = vld [vmem:[#allocation2 + $0x34] sm:$0xf0]  ;;  %v723_v54 = vld [vmem:[#allocation2 + $0xb0] sm:$0xf]  ;;  %v831_v56 = vld [vmem:[#allocation2 + $0x34] sm:$0xf] }
  0x1b   :  { %v848_v55 = vld [vmem:[#allocation2 + $0xb4] sm:$0xf0]  ;;  %v661_v57 = vld [vmem:[#allocation2 + $0x38] sm:$0xf0]  ;;  %v847_v58 = vld [vmem:[#allocation2 + $0xb4] sm:$0xf]  ;;  %v660_v60 = vor.u32 %v832_v53, %v659_v52 }
  0x1c   :  { %v725_v59 = vld [vmem:[#allocation2 + $0xb8] sm:$0xf0]  ;;  %v724_v61 = vor.u32 %v848_v55, %v723_v54  ;;  %v664_v62 = vor.u32 %v831_v56, %v661_v57  ;;  %v667_v0 = vld [vmem:[#allocation2 + $0x40] sm:$0xf]  ;;  %v834_v1 = vld [vmem:[#allocation2 + $0x44] sm:$0xf0] }
  0x1d   :  { %375 = vmatpush.bf16.msra.mxu0 %v860_v8  ;;  %877 = vmatpush.bf16.msra.mxu2 %v860_v8  ;;  %v728_v63 = vor.u32 %v847_v58, %v725_v59  ;;  %v731_v2 = vld [vmem:[#allocation2 + $0xc0] sm:$0xf]  ;;  %v850_v3 = vld [vmem:[#allocation2 + $0xc4] sm:$0xf0]  ;;  %v833_v4 = vld [vmem:[#allocation2 + $0x44] sm:$0xf]  ;;  %v668_v8 = vor.u32 %v834_v1, %v667_v0 }
  0x1e   :  { %464 = vmatpush.bf16.msra.mxu1 %v868_v9  ;;  %885 = vmatpush.bf16.msra.mxu3 %v868_v9  ;;  %v669_v5 = vld [vmem:[#allocation2 + $0x48] sm:$0xf0]  ;;  %v849_v6 = vld [vmem:[#allocation2 + $0xc4] sm:$0xf]  ;;  %v732_v9 = vor.u32 %v850_v3, %v731_v2  ;;  %v835_v16 = vld [vmem:[#allocation2 + $0x54] sm:$0xf] }
  0x1f   :  { %v733_v7 = vld [vmem:[#allocation2 + $0xc8] sm:$0xf0]  ;;  %v677_v17 = vld [vmem:[#allocation2 + $0x58] sm:$0xf0]  ;;  %v851_v18 = vld [vmem:[#allocation2 + $0xd4] sm:$0xf] }
  0x20   :  { %v741_v19 = vld [vmem:[#allocation2 + $0xd8] sm:$0xf0]  ;;  %v680_v22 = vor.u32 %v835_v16, %v677_v17  ;;  %v837_v28 = vld [vmem:[#allocation2 + $0x64] sm:$0xf]  ;;  %v685_v29 = vld [vmem:[#allocation2 + $0x68] sm:$0xf0] }
  0x21   :  { %376 = vmatpush.bf16.msra.mxu0 %v859_v10  ;;  %878 = vmatpush.bf16.msra.mxu2 %v859_v10  ;;  %v672_v10 = vor.u32 %v833_v4, %v669_v5  ;;  %v744_v23 = vor.u32 %v851_v18, %v741_v19  ;;  %v853_v30 = vld [vmem:[#allocation2 + $0xe4] sm:$0xf]  ;;  %v749_v31 = vld [vmem:[#allocation2 + $0xe8] sm:$0xf0]  ;;  %v688_v34 = vor.u32 %v837_v28, %v685_v29  ;;  %v839_v40 = vld [vmem:[#allocation2 + $0x74] sm:$0xf] }
  0x22   :  { %465 = vmatpush.bf16.msra.mxu1 %v867_v11  ;;  %886 = vmatpush.bf16.msra.mxu3 %v867_v11  ;;  %v736_v11 = vor.u32 %v849_v6, %v733_v7  ;;  %v752_v35 = vor.u32 %v853_v30, %v749_v31  ;;  %v693_v41 = vld [vmem:[#allocation2 + $0x78] sm:$0xf0]  ;;  %v855_v42 = vld [vmem:[#allocation2 + $0xf4] sm:$0xf] }
  0x23   :  { %v757_v43 = vld [vmem:[#allocation2 + $0xf8] sm:$0xf0]  ;;  %v696_v46 = vor.u32 %v839_v40, %v693_v41 }
  0x24   :  { %v760_v47 = vor.u32 %v855_v42, %v757_v43 }
  0x25   :  { %377 = vmatpush.bf16.msra.mxu0 %v858_v12  ;;  %879 = vmatpush.bf16.msra.mxu2 %v858_v12  ;;  %v675_v12 = vld [vmem:[#allocation2 + $0x50] sm:$0xf] }
  0x26   :  { %466 = vmatpush.bf16.msra.mxu1 %v866_v13  ;;  %887 = vmatpush.bf16.msra.mxu3 %v866_v13  ;;  %v836_v13 = vld [vmem:[#allocation2 + $0x54] sm:$0xf0] }
  0x27   :  { %v676_v20 = vor.u32 %v836_v13, %v675_v12 }
  0x29   :  { %378 = vmatpush.bf16.msra.mxu0 %v857_v14  ;;  %880 = vmatpush.bf16.msra.mxu2 %v857_v14  ;;  %v739_v14 = vld [vmem:[#allocation2 + $0xd0] sm:$0xf] }
  0x2a   :  { %467 = vmatpush.bf16.msra.mxu1 %v865_v15  ;;  %888 = vmatpush.bf16.msra.mxu3 %v865_v15  ;;  %v852_v15 = vld [vmem:[#allocation2 + $0xd4] sm:$0xf0] }
  0x2b   :  { %v740_v21 = vor.u32 %v852_v15, %v739_v14 }
  0x2c   :  { %379 = vmatmul.bf16.vlgmr.msra.gmra.mxu0 %v636_v24  ;;  %419 = vmatmul.bf16.vlgmr.msra.gmra.mxu2 %v700_v25  ;;  %v683_v24 = vld [vmem:[#allocation2 + $0x60] sm:$0xf]  ;;  %v838_v25 = vld [vmem:[#allocation2 + $0x64] sm:$0xf0] }
  0x2d   :  { %468 = vmatmul.bf16.vlgmr.msra.gmra.mxu1 %v640_v26  ;;  %508 = vmatmul.bf16.vlgmr.msra.gmra.mxu3 %v704_v27  ;;  %v747_v26 = vld [vmem:[#allocation2 + $0xe0] sm:$0xf]  ;;  %v854_v27 = vld [vmem:[#allocation2 + $0xe4] sm:$0xf0]  ;;  %v684_v32 = vor.u32 %v838_v25, %v683_v24 }
  0x2e   :  { %v748_v33 = vor.u32 %v854_v27, %v747_v26 }
  0x3c   :  { %384 = vmatmul.bf16.gmra.mxu0 %v644_v36  ;;  %424 = vmatmul.bf16.gmra.mxu2 %v708_v37  ;;  %v691_v36 = vld [vmem:[#allocation2 + $0x70] sm:$0xf]  ;;  %v840_v37 = vld [vmem:[#allocation2 + $0x74] sm:$0xf0] }
  0x3d   :  { %473 = vmatmul.bf16.gmra.mxu1 %v648_v38  ;;  %513 = vmatmul.bf16.gmra.mxu3 %v712_v39  ;;  %v755_v38 = vld [vmem:[#allocation2 + $0xf0] sm:$0xf]  ;;  %v856_v39 = vld [vmem:[#allocation2 + $0xf4] sm:$0xf0]  ;;  %v692_v44 = vor.u32 %v840_v37, %v691_v36 }
  0x3e   :  { %v756_v45 = vor.u32 %v856_v39, %v755_v38 }
  0x4c   :  { %389 = vmatmul.bf16.gmra.mxu0 %v652_v48  ;;  %429 = vmatmul.bf16.gmra.mxu2 %v716_v49  ;;  %v1014_v48 = vld [vmem:[%s1056_s2] ss:$0 sm:$0xff]  ;;  %s981_s2 = smov [#allocation7]  }
  0x4d   :  { %478 = vmatmul.bf16.gmra.mxu1 %v656_v50  ;;  %518 = vmatmul.bf16.gmra.mxu3 %v720_v51  ;;  %s617_s26 = sshll.u32 %s981_s2, 4  ;;  %s618_s26 = int_to_ptr.vmem [resolvable:$true] %s617_s26 }
  0x5c   :  { %394 = vmatmul.bf16.gmra.mxu0 %v660_v60  ;;  %434 = vmatmul.bf16.gmra.mxu2 %v724_v61 }
  0x5d   :  { %483 = vmatmul.bf16.gmra.mxu1 %v664_v62  ;;  %523 = vmatmul.bf16.gmra.mxu3 %v728_v63 }
  0x6c   :  { %399 = vmatmul.bf16.gmra.mxu0 %v668_v8  ;;  %439 = vmatmul.bf16.gmra.mxu2 %v732_v9 }
  0x6d   :  { %488 = vmatmul.bf16.gmra.mxu1 %v672_v10  ;;  %528 = vmatmul.bf16.gmra.mxu3 %v736_v11 }
  0x7c   :  { %404 = vmatmul.bf16.gmra.mxu0 %v676_v20  ;;  %444 = vmatmul.bf16.gmra.mxu2 %v740_v21 }
  0x7d   :  { %493 = vmatmul.bf16.gmra.mxu1 %v680_v22  ;;  %533 = vmatmul.bf16.gmra.mxu3 %v744_v23 }
  0x8c   :  { %409 = vmatmul.bf16.gmra.mxu0 %v684_v32  ;;  %449 = vmatmul.bf16.gmra.mxu2 %v748_v33 }
  0x8d   :  { %498 = vmatmul.bf16.gmra.mxu1 %v688_v34  ;;  %538 = vmatmul.bf16.gmra.mxu3 %v752_v35 }
  0x9c   :  { %414 = vmatmul.bf16.gmra.mxu0 %v692_v44  ;;  %454 = vmatmul.bf16.gmra.mxu2 %v756_v45 }
  0x9d   :  { %503 = vmatmul.bf16.gmra.mxu1 %v696_v46  ;;  %543 = vmatmul.bf16.gmra.mxu3 %v760_v47 }
  0xa9   :  { %v380_v49 = vpop.f32.mrf.mxu0 }
  0xaa   :  { %v381_v50 = vadd.f32 %v1014_v48, %v380_v49  ;;  %v469_v51 = vpop.f32.mrf.mxu1 }
  0xac   :  { %v470_v52 = vadd.f32 %v469_v51, %v381_v50 }
  0xae   :  { %v549_v53 = vmax.f32 %v470_v52, 0.0 }
  0xaf   :  { %v420_v54 = vpop.f32.mrf.mxu2 }
  0xb0   :  { %581 = vst [vmem:[#allocation7] sm:$0xff] %v549_v53  ;;  %v421_v55 = vadd.f32 %v1014_v48, %v420_v54  ;;  %v509_v56 = vpop.f32.mrf.mxu3 }
  0xb1   :  { %v382_v57 = vpop.f32.mrf.mxu0 }
  0xb2   :  { %v510_v58 = vadd.f32 %v509_v56, %v421_v55  ;;  %v383_v59 = vadd.f32 %v1014_v48, %v382_v57  ;;  %v471_v60 = vpop.f32.mrf.mxu1 }
  0xb4   :  { %v565_v61 = vmax.f32 %v510_v58, 0.0  ;;  %v472_v62 = vadd.f32 %v471_v60, %v383_v59 }
  0xb6   :  { %597 = vst [vmem:[#allocation7 + $0x80] sm:$0xff] %v565_v61  ;;  %v550_v63 = vmax.f32 %v472_v62, 0.0 }
  0xb7   :  { %v422_v0 = vpop.f32.mrf.mxu2 }
  0xb8   :  { %582 = vst [vmem:[#allocation7 + $0x8] sm:$0xff] %v550_v63  ;;  %v423_v1 = vadd.f32 %v1014_v48, %v422_v0  ;;  %v511_v2 = vpop.f32.mrf.mxu3 }
  0xb9   :  { %v385_v3 = vpop.f32.mrf.mxu0 }
  0xba   :  { %v512_v4 = vadd.f32 %v511_v2, %v423_v1  ;;  %v386_v5 = vadd.f32 %v1014_v48, %v385_v3  ;;  %v474_v6 = vpop.f32.mrf.mxu1 }
  0xbc   :  { %v566_v7 = vmax.f32 %v512_v4, 0.0  ;;  %v475_v8 = vadd.f32 %v474_v6, %v386_v5 }
  0xbe   :  { %598 = vst [vmem:[#allocation7 + $0x88] sm:$0xff] %v566_v7  ;;  %v551_v9 = vmax.f32 %v475_v8, 0.0 }
  0xbf   :  { %v425_v10 = vpop.f32.mrf.mxu2 }
  0xc0   :  { %583 = vst [vmem:[#allocation7 + $0x10] sm:$0xff] %v551_v9  ;;  %v426_v11 = vadd.f32 %v1014_v48, %v425_v10  ;;  %v514_v12 = vpop.f32.mrf.mxu3 }
  0xc1   :  { %v387_v13 = vpop.f32.mrf.mxu0 }
  0xc2   :  { %v515_v14 = vadd.f32 %v514_v12, %v426_v11  ;;  %v388_v15 = vadd.f32 %v1014_v48, %v387_v13  ;;  %v476_v16 = vpop.f32.mrf.mxu1 }
  0xc4   :  { %v567_v17 = vmax.f32 %v515_v14, 0.0  ;;  %v477_v18 = vadd.f32 %v476_v16, %v388_v15 }
  0xc6   :  { %599 = vst [vmem:[#allocation7 + $0x90] sm:$0xff] %v567_v17  ;;  %v552_v19 = vmax.f32 %v477_v18, 0.0 }
  0xc7   :  { %v427_v20 = vpop.f32.mrf.mxu2 }
  0xc8   :  { %584 = vst [vmem:[#allocation7 + $0x18] sm:$0xff] %v552_v19  ;;  %v428_v21 = vadd.f32 %v1014_v48, %v427_v20  ;;  %v516_v22 = vpop.f32.mrf.mxu3 }
  0xc9   :  { %v390_v23 = vpop.f32.mrf.mxu0 }
  0xca   :  { %v517_v24 = vadd.f32 %v516_v22, %v428_v21  ;;  %v391_v25 = vadd.f32 %v1014_v48, %v390_v23  ;;  %v479_v26 = vpop.f32.mrf.mxu1 }
  0xcc   :  { %v568_v27 = vmax.f32 %v517_v24, 0.0  ;;  %v480_v28 = vadd.f32 %v479_v26, %v391_v25 }
  0xce   :  { %600 = vst [vmem:[#allocation7 + $0x98] sm:$0xff] %v568_v27  ;;  %v553_v29 = vmax.f32 %v480_v28, 0.0 }
  0xcf   :  { %v430_v30 = vpop.f32.mrf.mxu2 }
  0xd0   :  { %585 = vst [vmem:[#allocation7 + $0x20] sm:$0xff] %v553_v29  ;;  %v431_v31 = vadd.f32 %v1014_v48, %v430_v30  ;;  %v519_v32 = vpop.f32.mrf.mxu3 }
  0xd1   :  { %v392_v33 = vpop.f32.mrf.mxu0 }
  0xd2   :  { %v520_v34 = vadd.f32 %v519_v32, %v431_v31  ;;  %v393_v35 = vadd.f32 %v1014_v48, %v392_v33  ;;  %v481_v36 = vpop.f32.mrf.mxu1 }
  0xd4   :  { %v569_v37 = vmax.f32 %v520_v34, 0.0  ;;  %v482_v38 = vadd.f32 %v481_v36, %v393_v35 }
  0xd6   :  { %601 = vst [vmem:[#allocation7 + $0xa0] sm:$0xff] %v569_v37  ;;  %v554_v39 = vmax.f32 %v482_v38, 0.0 }
  0xd7   :  { %v432_v40 = vpop.f32.mrf.mxu2 }
  0xd8   :  { %586 = vst [vmem:[#allocation7 + $0x28] sm:$0xff] %v554_v39  ;;  %v433_v41 = vadd.f32 %v1014_v48, %v432_v40  ;;  %v521_v42 = vpop.f32.mrf.mxu3 }
  0xd9   :  { %v395_v43 = vpop.f32.mrf.mxu0 }
  0xda   :  { %v522_v44 = vadd.f32 %v521_v42, %v433_v41  ;;  %v396_v45 = vadd.f32 %v1014_v48, %v395_v43  ;;  %v484_v46 = vpop.f32.mrf.mxu1 }
  0xdc   :  { %v570_v47 = vmax.f32 %v522_v44, 0.0  ;;  %v485_v49 = vadd.f32 %v484_v46, %v396_v45 }
  0xde   :  { %602 = vst [vmem:[#allocation7 + $0xa8] sm:$0xff] %v570_v47  ;;  %v555_v50 = vmax.f32 %v485_v49, 0.0 }
  0xdf   :  { %v435_v51 = vpop.f32.mrf.mxu2 }
  0xe0   :  { %587 = vst [vmem:[#allocation7 + $0x30] sm:$0xff] %v555_v50  ;;  %v436_v52 = vadd.f32 %v1014_v48, %v435_v51  ;;  %v524_v53 = vpop.f32.mrf.mxu3 }
  0xe1   :  { %v397_v54 = vpop.f32.mrf.mxu0 }
  0xe2   :  { %v525_v55 = vadd.f32 %v524_v53, %v436_v52  ;;  %v398_v56 = vadd.f32 %v1014_v48, %v397_v54  ;;  %v486_v57 = vpop.f32.mrf.mxu1 }
  0xe4   :  { %v571_v58 = vmax.f32 %v525_v55, 0.0  ;;  %v487_v59 = vadd.f32 %v486_v57, %v398_v56 }
  0xe6   :  { %603 = vst [vmem:[#allocation7 + $0xb0] sm:$0xff] %v571_v58  ;;  %v556_v60 = vmax.f32 %v487_v59, 0.0 }
  0xe7   :  { %v437_v61 = vpop.f32.mrf.mxu2 }
  0xe8   :  { %588 = vst [vmem:[#allocation7 + $0x38] sm:$0xff] %v556_v60  ;;  %v438_v62 = vadd.f32 %v1014_v48, %v437_v61  ;;  %v526_v63 = vpop.f32.mrf.mxu3 }
  0xe9   :  { %v400_v0 = vpop.f32.mrf.mxu0 }
  0xea   :  { %v527_v1 = vadd.f32 %v526_v63, %v438_v62  ;;  %v401_v2 = vadd.f32 %v1014_v48, %v400_v0  ;;  %v489_v3 = vpop.f32.mrf.mxu1 }
  0xec   :  { %v572_v4 = vmax.f32 %v527_v1, 0.0  ;;  %v490_v5 = vadd.f32 %v489_v3, %v401_v2 }
  0xee   :  { %604 = vst [vmem:[#allocation7 + $0xb8] sm:$0xff] %v572_v4  ;;  %v557_v6 = vmax.f32 %v490_v5, 0.0 }
  0xef   :  { %v440_v7 = vpop.f32.mrf.mxu2 }
  0xf0   :  { %589 = vst [vmem:[#allocation7 + $0x40] sm:$0xff] %v557_v6  ;;  %v441_v8 = vadd.f32 %v1014_v48, %v440_v7  ;;  %v529_v9 = vpop.f32.mrf.mxu3 }
  0xf1   :  { %v402_v10 = vpop.f32.mrf.mxu0 }
  0xf2   :  { %v530_v11 = vadd.f32 %v529_v9, %v441_v8  ;;  %v403_v12 = vadd.f32 %v1014_v48, %v402_v10  ;;  %v491_v13 = vpop.f32.mrf.mxu1 }
  0xf4   :  { %v573_v14 = vmax.f32 %v530_v11, 0.0  ;;  %v492_v15 = vadd.f32 %v491_v13, %v403_v12 }
  0xf6   :  { %605 = vst [vmem:[#allocation7 + $0xc0] sm:$0xff] %v573_v14  ;;  %v558_v16 = vmax.f32 %v492_v15, 0.0 }
  0xf7   :  { %v442_v17 = vpop.f32.mrf.mxu2 }
  0xf8   :  { %590 = vst [vmem:[#allocation7 + $0x48] sm:$0xff] %v558_v16  ;;  %v443_v18 = vadd.f32 %v1014_v48, %v442_v17  ;;  %v531_v19 = vpop.f32.mrf.mxu3 }
  0xf9   :  { %v405_v20 = vpop.f32.mrf.mxu0 }
  0xfa   :  { %v532_v21 = vadd.f32 %v531_v19, %v443_v18  ;;  %v406_v22 = vadd.f32 %v1014_v48, %v405_v20  ;;  %v494_v23 = vpop.f32.mrf.mxu1 }
  0xfc   :  { %v574_v24 = vmax.f32 %v532_v21, 0.0  ;;  %v495_v25 = vadd.f32 %v494_v23, %v406_v22 }
  0xfe   :  { %606 = vst [vmem:[#allocation7 + $0xc8] sm:$0xff] %v574_v24  ;;  %v559_v26 = vmax.f32 %v495_v25, 0.0 }
  0xff   :  { %v445_v27 = vpop.f32.mrf.mxu2 }
 0x100   :  { %591 = vst [vmem:[#allocation7 + $0x50] sm:$0xff] %v559_v26  ;;  %v446_v28 = vadd.f32 %v1014_v48, %v445_v27  ;;  %v534_v29 = vpop.f32.mrf.mxu3 }
 0x101   :  { %v407_v30 = vpop.f32.mrf.mxu0 }
 0x102   :  { %v535_v31 = vadd.f32 %v534_v29, %v446_v28  ;;  %v408_v32 = vadd.f32 %v1014_v48, %v407_v30  ;;  %v496_v33 = vpop.f32.mrf.mxu1 }
 0x104   :  { %v575_v34 = vmax.f32 %v535_v31, 0.0  ;;  %v497_v35 = vadd.f32 %v496_v33, %v408_v32 }
 0x106   :  { %607 = vst [vmem:[#allocation7 + $0xd0] sm:$0xff] %v575_v34  ;;  %v560_v36 = vmax.f32 %v497_v35, 0.0 }
 0x107   :  { %v447_v37 = vpop.f32.mrf.mxu2 }
 0x108   :  { %592 = vst [vmem:[#allocation7 + $0x58] sm:$0xff] %v560_v36  ;;  %v448_v38 = vadd.f32 %v1014_v48, %v447_v37  ;;  %v536_v39 = vpop.f32.mrf.mxu3 }
 0x109   :  { %v410_v40 = vpop.f32.mrf.mxu0 }
 0x10a   :  { %v537_v41 = vadd.f32 %v536_v39, %v448_v38  ;;  %v411_v42 = vadd.f32 %v1014_v48, %v410_v40  ;;  %v499_v43 = vpop.f32.mrf.mxu1 }
 0x10c   :  { %v576_v44 = vmax.f32 %v537_v41, 0.0  ;;  %v500_v45 = vadd.f32 %v499_v43, %v411_v42 }
 0x10e   :  { %608 = vst [vmem:[#allocation7 + $0xd8] sm:$0xff] %v576_v44  ;;  %v561_v46 = vmax.f32 %v500_v45, 0.0 }
 0x10f   :  { %v450_v47 = vpop.f32.mrf.mxu2 }
 0x110   :  { %593 = vst [vmem:[#allocation7 + $0x60] sm:$0xff] %v561_v46  ;;  %v451_v49 = vadd.f32 %v1014_v48, %v450_v47  ;;  %v539_v50 = vpop.f32.mrf.mxu3 }
 0x111   :  { %v412_v51 = vpop.f32.mrf.mxu0 }
 0x112   :  { %v540_v52 = vadd.f32 %v539_v50, %v451_v49  ;;  %v413_v53 = vadd.f32 %v1014_v48, %v412_v51  ;;  %v501_v54 = vpop.f32.mrf.mxu1 }
 0x114   :  { %v577_v55 = vmax.f32 %v540_v52, 0.0  ;;  %v502_v56 = vadd.f32 %v501_v54, %v413_v53 }
 0x116   :  { %609 = vst [vmem:[#allocation7 + $0xe0] sm:$0xff] %v577_v55  ;;  %v562_v57 = vmax.f32 %v502_v56, 0.0 }
 0x117   :  { %v452_v58 = vpop.f32.mrf.mxu2 }
 0x118   :  { %594 = vst [vmem:[#allocation7 + $0x68] sm:$0xff] %v562_v57  ;;  %v453_v59 = vadd.f32 %v1014_v48, %v452_v58  ;;  %v541_v60 = vpop.f32.mrf.mxu3 }
 0x119   :  { %v415_v61 = vpop.f32.mrf.mxu0 }
 0x11a   :  { %v542_v62 = vadd.f32 %v541_v60, %v453_v59  ;;  %v416_v63 = vadd.f32 %v1014_v48, %v415_v61  ;;  %v504_v0 = vpop.f32.mrf.mxu1 }
 0x11c   :  { %v578_v1 = vmax.f32 %v542_v62, 0.0  ;;  %v505_v2 = vadd.f32 %v504_v0, %v416_v63 }
 0x11e   :  { %610 = vst [vmem:[#allocation7 + $0xe8] sm:$0xff] %v578_v1  ;;  %v563_v3 = vmax.f32 %v505_v2, 0.0 }
 0x11f   :  { %v455_v4 = vpop.f32.mrf.mxu2 }
 0x120   :  { %595 = vst [vmem:[#allocation7 + $0x70] sm:$0xff] %v563_v3  ;;  %v456_v5 = vadd.f32 %v1014_v48, %v455_v4  ;;  %v544_v6 = vpop.f32.mrf.mxu3 }
 0x121   :  { %v417_v7 = vpop.f32.mrf.mxu0 }
 0x122   :  { %v545_v8 = vadd.f32 %v544_v6, %v456_v5  ;;  %v418_v9 = vadd.f32 %v1014_v48, %v417_v7  ;;  %v506_v10 = vpop.f32.mrf.mxu1 }
 0x124   :  { %v579_v11 = vmax.f32 %v545_v8, 0.0  ;;  %v507_v12 = vadd.f32 %v506_v10, %v418_v9 }
 0x126   :  { %611 = vst [vmem:[#allocation7 + $0xf0] sm:$0xff] %v579_v11  ;;  %v564_v13 = vmax.f32 %v507_v12, 0.0 }
 0x127   :  { %v457_v14 = vpop.f32.mrf.mxu2 }
 0x128   :  { %596 = vst [vmem:[#allocation7 + $0x78] sm:$0xff] %v564_v13  ;;  %v458_v15 = vadd.f32 %v1014_v48, %v457_v14  ;;  %v546_v16 = vpop.f32.mrf.mxu3 }
 0x12a   :  { %v547_v17 = vadd.f32 %v546_v16, %v458_v15 }
 0x12c   :  { %v580_v18 = vmax.f32 %v547_v17, 0.0 }
 0x12e   :  { %612 = vst [vmem:[#allocation7 + $0xf8] sm:$0xff] %v580_v18 }
 0x12f   :  { %625 = dma.vmem_to_hbm [thread:$0]  %s618_s26, 4096, %s620_s29, [#allocation4], %s976_s20, %s976_s20, %s977_s21  }
 0x130   :  { %973 = dma.done.wait [#allocation4], 4096  }
 0x131   :  { %974 = vsyncadd [#allocation4], 4294963200 }
 0x132   :  { %630 = vsyncpa [#allocation3], 1 }
 0x133   :  { %631 = vsyncpa [#allocation6], 1 }
 0x134   :  { %632 = vsyncpa [#allocation4], 1 }

</bundles_post_ra>
